<compile_context>
chip_gen: v7x
topology: tpu7x:2x2x1
jax: 0.10.0
libtpu: 0.0.40
codegen_flags: <defaults>
</compile_context>

<pallas_src>
import math

import jax
import jax.numpy as jnp
from jax.experimental import pallas as pl
from jax.experimental.pallas import tpu as pltpu


# ----------------------------------------------------------------------------
# Parameter folding (eval-mode BN + conv bias -> weights / per-channel shift)
# ----------------------------------------------------------------------------
def fold_conv_bn(weight, bias, gamma, beta, running_mean, running_var, eps=1e-5):
    """weight: (C_out, C_in, K) torch layout. Returns (K, C_out, C_in), (C_out, 1)."""
    c_out = weight.shape[0]
    s = gamma / jnp.sqrt(running_var + eps)
    w_folded = weight * s[:, None, None]                       # (C_out, C_in, K)
    b = bias if bias is not None else jnp.zeros((c_out,), weight.dtype)
    t_folded = s * b + beta - s * running_mean                 # (C_out,)
    w_taps = jnp.transpose(w_folded, (2, 0, 1))                # (K, C_out, C_in)
    return w_taps.astype(jnp.float32), t_folded.reshape(c_out, 1).astype(jnp.float32)


# ----------------------------------------------------------------------------
# Fused kernel: out = relu( sum_k W'[k] @ x[:, k : k + out_len]  +  t' )
# ----------------------------------------------------------------------------
def _make_conv_bn_relu_kernel(k_taps, out_len):
    def kernel(x_ref, w_ref, t_ref, o_ref):
        # x_ref: (C_in, L_block)   w_ref: (K, C_out, C_in)   t_ref: (C_out, 1)
        acc = jnp.dot(w_ref[0], x_ref[:, pl.ds(0, out_len)],
                      preferred_element_type=jnp.float32)
        for k in range(1, k_taps):                 # static unroll over conv taps
            acc = acc + jnp.dot(w_ref[k], x_ref[:, pl.ds(k, out_len)],
                                preferred_element_type=jnp.float32)
        acc = acc + t_ref[...].astype(jnp.float32)  # broadcast over lanes
        o_ref[...] = jnp.maximum(acc, 0.0).astype(o_ref.dtype)
    return kernel


def _choose_tile_l(length, max_tile=2048):
    """Largest lane tile <= max_tile that divides L, preferring multiples of 128."""
    if length <= max_tile:
        return length
    for t in range(max_tile, 127, -1):
        if length % t == 0 and t % 128 == 0:
            return t
    for t in range(max_tile, 0, -1):
        if length % t == 0:
            return t
    return length


# ----------------------------------------------------------------------------
# Wrapper
# ----------------------------------------------------------------------------
def conv_block_1d(x, weight, bias, gamma, beta, running_mean, running_var, *,
                  stride=1, padding=0, eps=1e-5, tile_l=None,
                  compute_dtype=None, max_tile_l=2048):
    """y = relu(BatchNorm1d_eval(Conv1d(x)))  on NCL input x: (N, C_in, L)."""
    n, c_in, length = x.shape
    c_out, c_in_w, ksz = weight.shape
    assert c_in_w == c_in, (c_in_w, c_in)
    if stride != 1:
        # TODO(synk): strided Conv1d (stride > 1) not implemented in the Pallas path.
        raise NotImplementedError("conv_block_1d: stride > 1 not supported")

    out_dtype = x.dtype
    w_taps, shift = fold_conv_bn(weight, bias, gamma, beta,
                                 running_mean, running_var, eps)
    if compute_dtype is not None:                 # e.g. jnp.bfloat16 on v6e/v7x
        x = x.astype(compute_dtype)
        w_taps = w_taps.astype(compute_dtype)

    if ksz == 1 and padding == 0:
        # ---- Fast path: pure per-position channel matmul, tiled along L ----
        tl = tile_l if tile_l is not None else _choose_tile_l(length, max_tile_l)
        assert length % tl == 0, f"tile_l={tl} must divide L={length}"
        grid = (n, length // tl)
        kernel = _make_conv_bn_relu_kernel(1, tl)
        return pl.pallas_call(
            kernel,
            grid=grid,
            in_specs=[
                pl.BlockSpec((None, c_in, tl), lambda i, j: (i, 0, j)),
                pl.BlockSpec(w_taps.shape, lambda i, j: (0, 0, 0)),
                pl.BlockSpec(shift.shape, lambda i, j: (0, 0)),
            ],
            out_specs=pl.BlockSpec((None, c_out, tl), lambda i, j: (i, 0, j)),
            out_shape=jax.ShapeDtypeStruct((n, c_out, length), out_dtype),
            compiler_params=pltpu.CompilerParams(
                dimension_semantics=("parallel", "parallel")),
        )(x, w_taps, shift)

    # ---- General path: any kernel_size / padding (stride=1). Whole (padded)
    # length per grid step; taps are static lane-offset slices of the block. ----
    # TODO(synk): add L-tiling with halo for very long sequences.
    if padding > 0:
        x = jnp.pad(x, ((0, 0), (0, 0), (padding, padding)))
    l_pad = length + 2 * padding
    l_out = l_pad - ksz + 1
    kernel = _make_conv_bn_relu_kernel(ksz, l_out)
    return pl.pallas_call(
        kernel,
        grid=(n,),
        in_specs=[
            pl.BlockSpec((None, c_in, l_pad), lambda i: (i, 0, 0)),
            pl.BlockSpec(w_taps.shape, lambda i: (0, 0, 0)),
            pl.BlockSpec(shift.shape, lambda i: (0, 0)),
        ],
        out_specs=pl.BlockSpec((None, c_out, l_out), lambda i: (i, 0, 0)),
        out_shape=jax.ShapeDtypeStruct((n, c_out, l_out), out_dtype),
        compiler_params=pltpu.CompilerParams(
            dimension_semantics=("parallel",)),
    )(x, w_taps, shift)


# ----------------------------------------------------------------------------
# Pure-JAX reference (unfused) for verification
# ----------------------------------------------------------------------------
def conv_block_1d_ref(x, weight, bias, gamma, beta, running_mean, running_var, *,
                      stride=1, padding=0, eps=1e-5):
    y = jax.lax.conv_general_dilated(
        x.astype(jnp.float32), weight.astype(jnp.float32),
        window_strides=(stride,), padding=[(padding, padding)],
        dimension_numbers=("NCH", "OIH", "NCH"))
    if bias is not None:
        y = y + bias[None, :, None]
    s = gamma / jnp.sqrt(running_var + eps)
    t = beta - running_mean * s
    y = y * s[None, :, None] + t[None, :, None]
    return jnp.maximum(y, 0.0)


def _init_params(key, c_in, c_out, ksz):
    ks = jax.random.split(key, 6)
    w = jax.random.normal(ks[0], (c_out, c_in, ksz), jnp.float32) / math.sqrt(c_in * ksz)
    b = 0.1 * jax.random.normal(ks[1], (c_out,), jnp.float32)
    gamma = 1.0 + 0.1 * jax.random.normal(ks[2], (c_out,), jnp.float32)
    beta = 0.1 * jax.random.normal(ks[3], (c_out,), jnp.float32)
    rm = 0.1 * jax.random.normal(ks[4], (c_out,), jnp.float32)
    rv = 1.0 + 0.1 * jax.random.uniform(ks[5], (c_out,), jnp.float32)
    return w, b, gamma, beta, rm, rv


if __name__ == "__main__":
    root = jax.random.PRNGKey(0)
    kx1, kp1, kx2, kp2 = jax.random.split(root, 4)

    # --- Config 1: 1x1 conv (tiled fast path), grid = (2 batches, 4 L-tiles) ---
    n, c_in, c_out, length = 2, 4, 16, 2048
    x1 = jax.random.normal(kx1, (n, c_in, length), jnp.float32)
    p1 = _init_params(kp1, c_in, c_out, 1)
    y1 = jax.block_until_ready(
        conv_block_1d(x1, *p1, stride=1, padding=0, tile_l=512))
    r1 = conv_block_1d_ref(x1, *p1, stride=1, padding=0)
    assert y1.shape == r1.shape, (y1.shape, r1.shape)
    assert jnp.allclose(y1, r1, atol=1e-4, rtol=1e-4), \
        float(jnp.max(jnp.abs(y1 - r1)))

    # --- Config 2: kernel_size=3, padding=1 (general tap-accumulation path) ---
    n, c_in, c_out, length = 2, 4, 8, 256
    x2 = jax.random.normal(kx2, (n, c_in, length), jnp.float32)
    p2 = _init_params(kp2, c_in, c_out, 3)
    y2 = jax.block_until_ready(conv_block_1d(x2, *p2, stride=1, padding=1))
    r2 = conv_block_1d_ref(x2, *p2, stride=1, padding=1)
    assert y2.shape == r2.shape, (y2.shape, r2.shape)
    assert jnp.allclose(y2, r2, atol=1e-4, rtol=1e-4), \
        float(jnp.max(jnp.abs(y2 - r2)))

    print("KERNEL_OK")
</pallas_src>

<mosaic_0001>
module attributes {stable_mosaic.version = 11 : i64} {
  func.func @kernel(%arg0: i32, %arg1: i32, %arg2: memref<1x4x512xf32, #tpu.memory_space<vmem>>, %arg3: memref<1x16x4xf32, #tpu.memory_space<vmem>>, %arg4: memref<16x1xf32, #tpu.memory_space<vmem>>, %arg5: memref<1x16x512xf32, #tpu.memory_space<vmem>>) attributes {dimension_semantics = [#tpu.dimension_semantics<parallel>, #tpu.dimension_semantics<parallel>], iteration_bounds = array<i64: 2, 4>, scalar_prefetch = 0 : i64, scratch_operands = 0 : i64, tpu.core_type = #tpu.core_type<tc>, window_params = [{transform_indices = @transform_0, window_bounds = array<i64: 1, 4, 512>}, {pipeline_mode = #tpu.pipeline_mode<synchronous>, transform_indices = @transform_1, window_bounds = array<i64: 1, 16, 4>}, {pipeline_mode = #tpu.pipeline_mode<synchronous>, transform_indices = @transform_2, window_bounds = array<i64: 16, 1>}, {transform_indices = @transform_3, window_bounds = array<i64: 1, 16, 512>}]} {
    %c0 = arith.constant 0 : index
    %c0_0 = arith.constant 0 : index
    %c0_1 = arith.constant 0 : index
    %0 = vector.load %arg3[%c0, %c0_0, %c0_1] : memref<1x16x4xf32, #tpu.memory_space<vmem>>, vector<1x16x4xf32>
    %1 = vector.shape_cast %0 : vector<1x16x4xf32> to vector<16x4xf32>
    %c0_2 = arith.constant 0 : index
    %c0_3 = arith.constant 0 : index
    %c0_4 = arith.constant 0 : index
    %2 = vector.load %arg2[%c0_2, %c0_3, %c0_4] : memref<1x4x512xf32, #tpu.memory_space<vmem>>, vector<1x4x512xf32>
    %3 = vector.shape_cast %2 : vector<1x4x512xf32> to vector<4x512xf32>
    %cst = arith.constant dense<0.000000e+00> : vector<16x512xf32>
    %4 = tpu.matmul %1, %3, %cst {dimension_numbers = #tpu.dot_dimension_numbers<[1], [0], [0], [1], [0, 0, 1, 1], [], []>} : vector<16x4xf32>, vector<4x512xf32>, vector<16x512xf32> -> vector<16x512xf32>
    %c0_5 = arith.constant 0 : index
    %c0_6 = arith.constant 0 : index
    %5 = vector.load %arg4[%c0_5, %c0_6] : memref<16x1xf32, #tpu.memory_space<vmem>>, vector<16x1xf32>
    %6 = vector.broadcast %5 : vector<16x1xf32> to vector<16x512xf32>
    %7 = arith.addf %4, %6 : vector<16x512xf32>
    %cst_7 = arith.constant 0.000000e+00 : f32
    %8 = vector.broadcast %cst_7 : f32 to vector<16x512xf32>
    %9 = arith.maximumf %7, %8 : vector<16x512xf32>
    %c0_8 = arith.constant 0 : index
    %c0_9 = arith.constant 0 : index
    %c0_10 = arith.constant 0 : index
    %10 = vector.load %arg5[%c0_8, %c0_9, %c0_10] : memref<1x16x512xf32, #tpu.memory_space<vmem>>, vector<1x16x512xf32>
    %11 = vector.shape_cast %10 : vector<1x16x512xf32> to vector<16x512xf32>
    %12 = vector.shape_cast %9 : vector<16x512xf32> to vector<1x16x512xf32>
    tpu.vector_store %arg5[%c0_8, %c0_9, %c0_10], %12 {strides = array<i32>} : memref<1x16x512xf32, #tpu.memory_space<vmem>>, vector<1x16x512xf32>,
    return
  }
  func.func @transform_0(%arg0: i32, %arg1: i32) -> (i32, i32, i32) {
    %c0_i32 = arith.constant 0 : i32
    %c0_i32_0 = arith.constant 0 : i32
    return %arg0, %c0_i32, %arg1 : i32, i32, i32
  }
  func.func @transform_1(%arg0: i32, %arg1: i32) -> (i32, i32, i32) {
    %c0_i32 = arith.constant 0 : i32
    %c0_i32_0 = arith.constant 0 : i32
    %c0_i32_1 = arith.constant 0 : i32
    %c0_i32_2 = arith.constant 0 : i32
    return %c0_i32, %c0_i32_0, %c0_i32_1 : i32, i32, i32
  }
  func.func @transform_2(%arg0: i32, %arg1: i32) -> (i32, i32) {
    %c0_i32 = arith.constant 0 : i32
    %c0_i32_0 = arith.constant 0 : i32
    %c0_i32_1 = arith.constant 0 : i32
    return %c0_i32, %c0_i32_0 : i32, i32
  }
  func.func @transform_3(%arg0: i32, %arg1: i32) -> (i32, i32, i32) {
    %c0_i32 = arith.constant 0 : i32
    %c0_i32_0 = arith.constant 0 : i32
    return %arg0, %c0_i32, %arg1 : i32, i32, i32
  }
}

</mosaic_0001>

<bundles_post_ra>
// kernel: tpu_custom_call.1
= control target key start
LH: loop header
LB: loop body
LE: loop exit
PB: predicated region body
PF: predicated region fallthrough
CT: control target
= control target key end

     0   :  { %8 = vsyncpa [#allocation3], 0  ;;  %s996_s0 = inlined_call_operand.hbm [shape: f32[2,4,2048], index: 0, kind: input, shape index: {}]   ;;  %s997_s1 = inlined_call_operand.vmem [shape: f32[1,16,4], index: 1, kind: input, shape index: {}]   ;;  %s998_s2 = inlined_call_operand.vmem [shape: f32[16,1], index: 2, kind: input, shape index: {}]   ;;  %s999_s3 = inlined_call_operand.hbm [shape: f32[2,16,2048], index: 3, kind: output, shape index: {}]  }
   0x1   :  { %10 = vsyncpa [#allocation3 + $0x1], 0 }
   0x2   :  { %11 = vsyncpa [#allocation4], 0 }
   0x3   :  { %13 = vsyncpa [#allocation4 + $0x1], 0  ;;  %s787_s12 = smov 0   ;;  %s789_s13 = smov 0  }
   0x4   :  { %s791_s14 = smov 0   ;;  %s793_s15 = smov 0  }
   0x5   :  { %s795_s16 = smov 0   ;;  %s797_s17 = smov 0  }
   0x6   :  { %s799_s18 = smov 0   ;;  %s801_s19 = smov 0  }
   0x7 LB: > { %s519_s20 = sadd.s32 4294967295, %s758_s19   ;;  %s520_s21 = sadd.s32 4294967294, %s758_s19   ;;  %s758_s19 = sphi %s801_s19, %s19_s19   ;;  %s754_s18 = sphi %s799_s18, %s1016_s18   ;;  %s750_s17 = sphi %s797_s17, %s1015_s17   ;;  %s746_s16 = sphi %s795_s16, %s1014_s16   ;;  %s742_s15 = sphi %s793_s15, %s1013_s15   ;;  %s738_s14 = sphi %s791_s14, %s1012_s14   ;;  %s734_s13 = sphi %s789_s13, %s1011_s13   ;;  %s730_s12 = sphi %s787_s12, %s1010_s12  }
   0x8   : > { %s28_s22 = sadd.s32 1, %s750_s17  ;;  %s31_s23 = sadd.s32 1, %s754_s18 }
   0x9   : > { %p29_p0 = scmp.ge.s32.totalorder %s28_s22, 4  ;;  %s40_s24 = sadd.s32 1, %s738_s14 }
   0xa   : > { %p47_p1 = scmp.ne.s32.totalorder %s738_s14, %s734_s13  ;;  %p48_p2 = scmp.eq.s32.totalorder %s758_s19, 0 }
   0xb   : > { %s1018_s22 = smov (%p29_p0, %s28_s22), 0  ;;  %s1020_s23 = smov (!%p29_p0, %s31_s23), %s754_s18 }
   0xc   : > { %s36_s25 = ssub.s32 %s750_s17, %s1018_s22  ;;  %p840_p3 = por %p48_p2, %p47_p1 }
   0xd   : > { %p33_p4 = scmp.ge.s32.totalorder %s1020_s23, 2  ;;  %p53_p5 = scmp.ne.s32.totalorder %s734_s13, %s730_s12 }
   0xe   : > { %p54_p6 = scmp.eq.s32.totalorder %s519_s20, 0  ;;  %p121_p7 = scmp.eq.s32.totalorder %s519_s20, 7 }
   0xf   : > { %s1022_s23 = smov (%p33_p4, %s1020_s23), 0  ;;  %p127_p10 = scmp.eq.s32.totalorder %s520_s21, 7 }
  0x10   : > { %p848_p8 = por %p54_p6, %p53_p5  ;;  %p852_p9 = por %p121_p7, %p47_p1 }
  0x11   : > { %s35_s29 = ssub.s32 %s754_s18, %s1022_s23  ;;  %p858_p12 = por %p127_p10, %p53_p5 }
  0x12   : > { %s1003_s28 = scalar_select %p852_p9, 1, 0 }
  0x13   : > { %s37_s30 = sor.u32 %s36_s25, %s35_s29  ;;  %p556_p13 = scmp.lt.s32.totalorder %s758_s19, 8 }
  0x14   : > { %p38_p11 = scmp.eq.s32.totalorder %s37_s30, 0  ;;  %s153_s5 = sand.u32 1, %s738_s14  }
  0x15   : > { %s1004_s4 = scalar_select %p858_p12, 1, 0 }
  0x16   : > { %s865_s6 = scalar_select %p38_p11, %s738_s14, %s40_s24  }
  0x17   : > { %s523_s7 = sshll.u32 %s153_s5, 4  ;;  %s524_s8 = sshll.u32 %s750_s17, 2 }
  0x18   : > { %s525_s9 = sshll.u32 %s754_s18, 4  ;;  %s157_s10 = scalar_lea.vmem [#allocation2], %s523_s7 }
  0x19   : > { %s167_s11 = sshll.u32 %s157_s10, 4  ;;  %s163_s20 = sadd.s32 %s525_s9, %s524_s8  ;;  %s869_s11 = int_to_ptr.vmem [resolvable:$true] %s167_s11 }
  0x1a   : > { %s526_s21 = sshll.u32 %s163_s20, 6  ;;  %p873_p0 = pnand %p556_p13, %p840_p3 }
  0x1b   : > { %s880_s24 = scalar_lea.hbm %s996_s0, %s526_s21  ;;  %s154_s7 = scalar_lea.sflag [#allocation3], %s153_s5 }
  0x1c   : > { %s630_s8 = scalar_lea.hbm %s880_s24, 256  ;;  %p632_p3 = pneg %p873_p0 }
  0x1d   : > { %p631_p4 = scmp.ne.s32.totalorder %s880_s24, %s630_s8  ;;  %s635_s10 = scalar_lea.hbm %s996_s0, 2048 }
  0x1e   : > { %p636_p7 = scmp.lt.u32.totalorder %s880_s24, %s996_s0  ;;  %p637_p10 = scmp.lt.u32.totalorder %s635_s10, %s630_s8 }
  0x1f   : > { %p633_p5 = pnand %p632_p3, %p631_p4  ;;  %p639_p13 = scmp.lt.u32.totalorder %s630_s8, %s880_s24 }
  0x20   : > { %p638_p11 = por %p637_p10, %p636_p7 }
  0x21   : > { %p634_p6 = pneg %p633_p5 }
  0x22   : > { %p640_p1 = por %p639_p13, %p638_p11 }
  0x24   : > { %p641_p2 = pnand %p640_p1, %p634_p6 }
  0x26   : > { %644 = shalt.err (!%p641_p2)
}
  0x27   : > { %s645_s5 = scalar_lea.vmem %s869_s11, 256  ;;  %s760_s29 = smov [#allocation2]  }
  0x28   : > { %p646_p4 = scmp.ne.s32.totalorder %s869_s11, %s645_s5  ;;  %s650_s30 = sshll.u32 %s760_s29, 4  ;;  %s651_s30 = int_to_ptr.vmem [resolvable:$false] %s650_s30 }
  0x29   : > { %s652_s26 = scalar_lea.vmem %s651_s30, 512  ;;  %p653_p9 = scmp.lt.s32.totalorder %s869_s11, %s651_s30 }
  0x2a   : > { %p648_p5 = pnand %p646_p4, %p632_p3  ;;  %p654_p7 = scmp.lt.s32.totalorder %s652_s26, %s645_s5 }
  0x2c   : > { %p649_p12 = pneg %p648_p5  ;;  %p655_p10 = por %p654_p7, %p653_p9 }
  0x2e   : > { %p656_p11 = pnand %p655_p10, %p649_p12 }
  0x30   : > { %659 = shalt.err (!%p656_p11)
}
  0x31   : > { %551 = dma.hbm_to_vmem [thread:$0]  (!%p873_p0), %s880_s24, 256, %s869_s11, %s154_s7  }
  0x32   : > { %p1006_p1 = scmp.lt.s32.totalorder %s758_s19, 9  ;;  %p1007_p2 = scmp.ge.s32.totalorder %s758_s19, 1 }
  0x34   : > { %p173_p3 = pnand %p1007_p2, %p1006_p1 }
  0x35   : > { %s914_s8 = sand.u32 (!%p173_p3), 1, %s734_s13  }
  0x36   : > { %176 = sbr.rel (%p173_p3) target bundleno = 305 (0x131), region = 32  ;;  %s528_s9 = sshll.u32 (!%p173_p3), %s914_s8, 4 }
  0x37   : > { %s179_s10 = scalar_lea.sflag (!%p173_p3), [#allocation3], %s914_s8  ;;  %s182_s20 = scalar_lea.vmem (!%p173_p3), [#allocation2], %s528_s9 }
  0x3d   : > { %721 = dma.done.wait (%p848_p8), %s179_s10, 256  }
  0x3e   : > { %723 = vsyncadd (%p848_p8), %s179_s10, 4294967040  ;;  %v761_v0 = vmov 0.0   ;;  %v762_v1 = vmov 0   ;;  %v209_v2 = vld [vmem:[%s182_s20] sm:$0xff]  ;;  %vm234_vm0 = vcmask 1043456   ;;  %v210_v3 = vld [vmem:[%s182_s20 + $0x8] sm:$0xff] }
  0x3f   : > { %307 = vmatprep.mubr.f32.mxu0 %v761_v0  ;;  %384 = vmatprep.mubr.f32.mxu1 %v761_v0  ;;  %v225_v4 = vcombine.high %v209_v2, %v209_v2  ;;  %v226_v5 = vcombine.high %v210_v3, %v210_v3  ;;  %v211_v6 = vld [vmem:[%s998_s2] sm:$0xff]  ;;  %vm227_vm1 = vcmask 31744   ;;  %v212_v8 = vld [vmem:[%s998_s2 + $0x8] sm:$0xff]  ;;  %s539_s30 = sshll.u32 %s742_s15, 2  ;;  %s540_s26 = sshll.u32 %s746_s16, 5 }
  0x40   : > { %627 = vset.pattern.permute.xlu0 %v762_v1  ;;  %v207_v7 = vld [vmem:[%s997_s1] sm:$0xff]  ;;  %v208_v9 = vld [vmem:[%s997_s1 + $0x8] sm:$0xff]  ;;  %s529_s9 = sshll.u32 %s914_s8, 6  ;;  %s426_s10 = sadd.s32 %s540_s26, %s539_s30 }
  0x41   : > { %215 = vperm.xlu0 %627, %v211_v6   ;;  %530 = vmatprep.subr.msk.mxu0 %vm234_vm0, %v225_v4  ;;  %s204_s20 = scalar_lea.vmem [#allocation5], %s529_s9  ;;  %s541_s15 = sshll.u32 %s426_s10, 7 }
  0x42   : > { %534 = vmatprep.subr.msk.mxu1 %vm234_vm0, %v226_v5  ;;  %531 = vmatpush1.msk.msra.mxu0 %vm234_vm0, %v209_v2  ;;  %s429_s11 = sshll.u32 %s204_s20, 4  ;;  %s942_s24 = scalar_lea.hbm %s999_s3, %s541_s15  ;;  %s937_s11 = int_to_ptr.vmem [resolvable:$true] %s429_s11 }
  0x43   : > { %535 = vmatpush1.msk.msra.mxu1 %vm234_vm0, %v210_v3  ;;  %532 = vmatmul.mubr.msk.f32.vlgmr.msra.gmra.mrb[0].mxu0 %vm227_vm1, %v207_v7  ;;  %s414_s7 = scalar_lea.sflag [#allocation4], %s914_s8  ;;  %s660_s27 = scalar_lea.vmem %s937_s11, 1024 }
  0x44   : > { %536 = vmatmul.mubr.msk.f32.vlgmr.msra.gmra.mrb[0].mxu1 %vm227_vm1, %v207_v7  ;;  %313 = vmatprep.mubr.f32.mxu0 %v761_v0  ;;  %p661_p8 = scmp.ne.s32.totalorder %s937_s11, %s660_s27  ;;  %p1008_p9 = scmp.ne.s32.totalorder %s1003_s28, 0 }
  0x45   : > { %390 = vmatprep.mubr.f32.mxu1 %v761_v0  ;;  %220 = vperm.xlu0 %627, %v212_v8   ;;  %s763_s21 = smov [#allocation5]  }
  0x46   : > { %p662_p12 = pnand %p661_p8, %p1008_p9  ;;  %s664_s5 = sshll.u32 %s763_s21, 4  ;;  %s665_s5 = int_to_ptr.vmem [resolvable:$false] %s664_s5 }
  0x47   : > { %533 = vmatmul.mubr.msk.f32.gmra.mrb[2].mxu0 %vm227_vm1, %v208_v9  ;;  %s666_s29 = scalar_lea.vmem %s665_s5, 2048  ;;  %p667_p6 = scmp.lt.s32.totalorder %s937_s11, %s665_s5 }
  0x48   : > { %537 = vmatmul.mubr.msk.f32.gmra.mrb[2].mxu1 %vm227_vm1, %v208_v9  ;;  %p663_p0 = pneg %p662_p12  ;;  %p668_p13 = scmp.lt.s32.totalorder %s666_s29, %s660_s27 }
  0x4a   : > { %p669_p4 = por %p668_p13, %p667_p6 }
  0x4c   : > { %p670_p5 = pnand %p669_p4, %p663_p0 }
  0xc0   : > { %v216_v10 = vpop.permute.xlu0 %215 }
  0xc4   : > { %v221_v21 = vpop.permute.xlu0 %220 }
 0x116   : > { %v309_v11 = vpop.f32.mrb[0].mxu0 }
 0x117   : > { %v386_v12 = vpop.f32.mrb[0].mxu1  ;;  %v310_v13 = vadd.f32 %v309_v11, %v216_v10  ;;  %v311_v15 = vpop.f32.mrb[1].mxu0 }
 0x118   : > { %v387_v14 = vadd.f32 %v386_v12, %v216_v10  ;;  %v388_v16 = vpop.f32.mrb[1].mxu1  ;;  %v312_v17 = vadd.f32 %v311_v15, %v216_v10 }
 0x119   : > { %v389_v18 = vadd.f32 %v388_v16, %v216_v10  ;;  %v397_v19 = vmax.f32 %v310_v13, 0.0 }
 0x11a   : > { %v399_v20 = vmax.f32 %v387_v14, 0.0  ;;  %v398_v22 = vmax.f32 %v312_v17, 0.0  ;;  %v315_v24 = vpop.f32.mrb[2].mxu0 }
 0x11b   : > { %v400_v23 = vmax.f32 %v389_v18, 0.0  ;;  %v392_v25 = vpop.f32.mrb[2].mxu1  ;;  %405 = vst [vmem:[%s204_s20] sm:$0xff] %v397_v19  ;;  %v316_v26 = vadd.f32 %v315_v24, %v221_v21  ;;  %v317_v28 = vpop.f32.mrb[3].mxu0 }
 0x11c   : > { %407 = vst [vmem:[%s204_s20 + $0x10] sm:$0xff] %v399_v20  ;;  %v393_v27 = vadd.f32 %v392_v25, %v221_v21  ;;  %v394_v29 = vpop.f32.mrb[3].mxu1  ;;  %406 = vst [vmem:[%s204_s20 + $0x8] sm:$0xff] %v398_v22  ;;  %v318_v30 = vadd.f32 %v317_v28, %v221_v21 }
 0x11d   : > { %408 = vst [vmem:[%s204_s20 + $0x18] sm:$0xff] %v400_v23  ;;  %v395_v31 = vadd.f32 %v394_v29, %v221_v21  ;;  %v401_v32 = vmax.f32 %v316_v26, 0.0 }
 0x11e   : > { %v403_v33 = vmax.f32 %v393_v27, 0.0  ;;  %v402_v34 = vmax.f32 %v318_v30, 0.0 }
 0x11f   : > { %v404_v35 = vmax.f32 %v395_v31, 0.0  ;;  %409 = vst [vmem:[%s204_s20 + $0x20] sm:$0xff] %v401_v32 }
 0x120   : > { %411 = vst [vmem:[%s204_s20 + $0x30] sm:$0xff] %v403_v33  ;;  %410 = vst [vmem:[%s204_s20 + $0x28] sm:$0xff] %v402_v34 }
 0x121   : > { %412 = vst [vmem:[%s204_s20 + $0x38] sm:$0xff] %v404_v35 }
 0x122   : > { %673 = shalt.err (!%p670_p5)
}
 0x123   : > { %s674_s30 = scalar_lea.hbm %s942_s24, 1024  ;;  %s678_s10 = scalar_lea.hbm %s999_s3, 8192 }
 0x124   : > { %p675_p7 = scmp.ne.s32.totalorder %s942_s24, %s674_s30  ;;  %p679_p1 = scmp.lt.u32.totalorder %s942_s24, %s999_s3 }
 0x125   : > { %p680_p2 = scmp.lt.u32.totalorder %s678_s10, %s674_s30  ;;  %p682_p8 = scmp.lt.u32.totalorder %s674_s30, %s942_s24 }
 0x126   : > { %p676_p10 = pnand %p675_p7, %p1008_p9 }
 0x127   : > { %p681_p3 = por %p680_p2, %p679_p1 }
 0x128   : > { %p677_p11 = pneg %p676_p10 }
 0x129   : > { %p683_p12 = por %p682_p8, %p681_p3 }
 0x12b   : > { %p684_p0 = pnand %p683_p12, %p677_p11 }
 0x12d   : > { %687 = shalt.err (!%p684_p0)
}
 0x12e   : > { %s764_s16 = smov 512   ;;  %s765_s25 = smov 2048  }
 0x12f   : > { %s766_s27 = smov 32  }
 0x130   : > { %546 = dma.vmem_to_hbm [thread:$0]  (%p1008_p9), %s937_s11, 1024, %s942_s24, %s414_s7, %s764_s16, %s765_s25, %s766_s27  }
 0x131 PF: > { %p557_p6 = scmp.ge.s32.totalorder %s758_s19, 2  ;;  %s444_s21 = sand.u32 1, %s730_s12  }
 0x132   : > { %p1009_p13 = scmp.ne.s32.totalorder %s1004_s4, 0  ;;  %s445_s5 = scalar_lea.sflag [#allocation4], %s444_s21 }
 0x134   : > { %p553_p4 = pnand %p557_p6, %p1009_p13 }
 0x136   : > { %725 = dma.done.wait (!%p553_p4), %s445_s5, 1024  }
 0x137   : > { %727 = vsyncadd (!%p553_p4), %s445_s5, 4294966272  ;;  %s19_s19 = sadd.s32 1, %s758_s19   ;;  %s1010_s12 = smov %s734_s13 }
 0x138   : > { %p16_p5 = scmp.ge.s32.totalorder %s19_s19, 10   ;;  %s1011_s13 = smov %s738_s14 }
 0x139   : > { %s1012_s14 = smov %s865_s6  ;;  %s1013_s15 = smov %s750_s17 }
 0x13a   : > { %s1014_s16 = smov %s754_s18  ;;  %s1015_s17 = smov %s1018_s22 }
 0x13b   : > { %s1016_s18 = smov %s1022_s23  ;;  %18 = sbr.rel (!%p16_p5) target bundleno = 7 (0x7), region = 77 }
 0x142   :  { %450 = vsyncpa [#allocation3], 1 }
 0x143   :  { %452 = vsyncpa [#allocation3 + $0x1], 1 }
 0x144   :  { %453 = vsyncpa [#allocation4], 1 }
 0x145   :  { %455 = vsyncpa [#allocation4 + $0x1], 1 }

</bundles_post_ra>
